<compile_context>
chip_gen: v5e
topology: v5e:2x2
jax: 0.10.0
libtpu: 0.0.40
codegen_flags: <defaults>
</compile_context>

<pallas_src>
import math
import random

import jax
import jax.numpy as jnp
import numpy as np
from jax import lax
from jax.experimental import pallas as pl
from jax.experimental.pallas import tpu as pltpu


# ---------------------------------------------------------------------------
# Kernel 1: embed = feats @ W   (hoisted out of the aggregation grid)
# ---------------------------------------------------------------------------
def embed_kernel(feat_ref, w_ref, embed_ref):
    # bf16 operands, f32 MXU accumulation.  Output stays f32 so the gather
    # kernel does unpacked single-sublane dynamic row loads.
    embed_ref[...] = jnp.dot(
        feat_ref[...], w_ref[...], preferred_element_type=jnp.float32
    )


def compute_embed(feats, w, *, tile_u=512):
    """feats bf16[U,D] @ w bf16[D,D] -> f32[U,D].  U, D multiples of 128."""
    u, d = feats.shape
    assert w.shape == (d, d)
    assert u % 128 == 0 and d % 128 == 0, "pad U/D to 128 lanes on the host"
    tile_u = min(tile_u, u)
    assert u % tile_u == 0

    cost = pl.CostEstimate(
        flops=2 * u * d * d,
        transcendentals=0,
        bytes_accessed=(feats.size + w.size) * 2 + u * d * 4,
    )
    return pl.pallas_call(
        embed_kernel,
        out_shape=jax.ShapeDtypeStruct((u, d), jnp.float32),
        grid=(u // tile_u,),
        in_specs=[
            pl.BlockSpec((tile_u, d), lambda i: (i, 0)),  # feats: streamed
            pl.BlockSpec((d, d), lambda i: (0, 0)),       # W: resident, DMA'd once
        ],
        out_specs=pl.BlockSpec((tile_u, d), lambda i: (i, 0)),
        compiler_params=pltpu.CompilerParams(
            dimension_semantics=("parallel",),
        ),
        cost_estimate=cost,
    )(feats, w)


# ---------------------------------------------------------------------------
# Kernel 2: to_feats = relu(mask @ embed) via sparse gather-sum
#   nb_ref   : int32[N_pad, max_keep] neighbor-row indices (SMEM, prefetched)
#   embed_ref: f32[U_pad, D_pad] resident in VMEM
#   out_ref  : [tile_n, D_pad] (bf16 by default)
#   acc_ref  : f32[tile_n, D_pad] VMEM scratch
# ---------------------------------------------------------------------------
def sparse_agg_kernel(nb_ref, embed_ref, out_ref, acc_ref):
    tile_n, d = out_ref.shape
    max_keep = nb_ref.shape[1]
    base = pl.program_id(0) * tile_n
    n_groups = tile_n // 8  # 8 f32 rows == one (8, 128) sublane tile

    def group_body(g, carry):
        row0 = pl.multiple_of(g * 8, 8)
        rows = []
        for rr in range(8):                      # static unroll
            acc = jnp.zeros((1, d), jnp.float32)
            for j in range(max_keep):            # static unroll (max_keep ~ 10)
                idx = nb_ref[base + row0 + rr, j]
                acc = acc + embed_ref[pl.ds(idx, 1), :]
            rows.append(acc)
        acc_ref[pl.ds(row0, 8), :] = jnp.concatenate(rows, axis=0)
        return carry

    lax.fori_loop(0, n_groups, group_body, 0)

    # Single lane-dense, fully vectorized store (bf16 halves writeback bytes).
    out_ref[...] = jnp.maximum(acc_ref[...], 0.0).astype(out_ref.dtype)


def pool_aggregate(nb_idx, embed, *, tile_n=256, out_dtype=jnp.bfloat16):
    """relu(per-node sum of gathered embed rows) == relu(mask @ embed).

    nb_idx : int32[N_pad, max_keep] row indices into `embed`; padding slots
             must point at a zero row of `embed`.
    embed  : f32[U_pad, D_pad]  (= feats @ W), D_pad % 128 == 0, U_pad % 8 == 0.
    returns: out_dtype[N_pad, D_pad].
    """
    n_pad, max_keep = nb_idx.shape
    u_pad, d_pad = embed.shape
    assert d_pad % 128 == 0 and u_pad % 8 == 0
    tile_n = min(tile_n, n_pad)
    assert tile_n % 16 == 0, "use multiples of 16 rows (bf16 sublane packing)"
    assert n_pad % tile_n == 0
    grid_n = n_pad // tile_n

    out_itemsize = jnp.dtype(out_dtype).itemsize
    cost = pl.CostEstimate(
        flops=n_pad * max_keep * d_pad + n_pad * d_pad,  # gather-adds + relu
        transcendentals=0,
        # embed and the index table are read once; output written once.
        bytes_accessed=embed.size * 4 + nb_idx.size * 4
        + n_pad * d_pad * out_itemsize,
    )

    # VMEM budget: resident embed (constant index_map -> DMA'd once; default
    # pipelining still reserves 2 buffers -- pipeline_mode=pl.Buffered(1) would
    # halve that footprint once it matters at production U), plus
    # double-buffered output tile and the f32 accumulator scratch.
    vmem_bytes = (
        2 * embed.size * 4
        + 2 * tile_n * d_pad * out_itemsize
        + tile_n * d_pad * 4
        + (8 << 20)  # headroom
    )

    grid_spec = pltpu.PrefetchScalarGridSpec(
        num_scalar_prefetch=1,  # nb_idx lands in SMEM before the grid runs
        grid=(grid_n,),
        in_specs=[
            pl.BlockSpec((u_pad, d_pad), lambda i, nb: (0, 0)),  # embed resident
        ],
        out_specs=pl.BlockSpec((tile_n, d_pad), lambda i, nb: (i, 0)),
        scratch_shapes=[pltpu.VMEM((tile_n, d_pad), jnp.float32)],
    )
    return pl.pallas_call(
        sparse_agg_kernel,
        out_shape=jax.ShapeDtypeStruct((n_pad, d_pad), out_dtype),
        grid_spec=grid_spec,
        compiler_params=pltpu.CompilerParams(
            dimension_semantics=("parallel",),  # node tiles shard across TCs (v7x)
            vmem_limit_bytes=int(min(vmem_bytes, 100 << 20)),
        ),
        cost_estimate=cost,
    )(nb_idx, embed)


# ---------------------------------------------------------------------------
# Host-side glue (mirrors the torch forward) + self-check
# ---------------------------------------------------------------------------
def xavier_uniform(key, shape):
    fan_in, fan_out = shape
    bound = math.sqrt(6.0 / (fan_in + fan_out))
    return jax.random.uniform(key, shape, jnp.float32, -bound, bound)


def _round_up(x, m):
    return ((x + m - 1) // m) * m


if __name__ == "__main__":
    # --- deterministic synthetic graph / parameters --------------------------
    feat_dim = 32           # feature_dims[mode]
    num_total_nodes = 64    # synthetic feature table size
    num_batch_nodes = 6     # len(to_neighs)
    keep_prob, max_keep = 0.5, 10

    root = jax.random.PRNGKey(0)
    k_feat, k_w = jax.random.split(root)

    feature_table = jax.random.normal(
        k_feat, (num_total_nodes, feat_dim), jnp.float32
    )
    pool_matrix = xavier_uniform(k_w, (feat_dim, feat_dim))

    # --- neighbor dropout / sampling (host-side glue, like torch forward) ----
    rng = random.Random(0)
    to_neighs = [
        rng.sample(range(num_total_nodes), rng.randint(4, 9))
        for _ in range(num_batch_nodes)
    ]
    samp_neighs = [
        set(rng.sample(tuple(neigh),
                       min(int(math.ceil(len(neigh) * keep_prob)), max_keep)))
        for neigh in to_neighs
    ]
    unique_nodes_list = sorted(set.union(*samp_neighs))
    unique_nodes = {n: i for i, n in enumerate(unique_nodes_list)}

    n_nodes = len(samp_neighs)
    n_unique = len(unique_nodes_list)

    # --- lane-dense TPU shapes (zero padding is exact for this math) ---------
    tile_n = 16                                   # toy path; production 256-512
    d_pad = _round_up(feat_dim, 128)
    u_pad = _round_up(n_unique + 1, 128)          # +1 guarantees a zero row
    zero_row = n_unique                           # rows >= n_unique are zero
    n_pad = max(_round_up(n_nodes, tile_n), 2 * tile_n)  # grid_n >= 2 for v7x TCs

    # Neighbor-index table replaces the dense 0/1 mask entirely.
    nb_np = np.full((n_pad, max_keep), zero_row, dtype=np.int32)
    for i, samp in enumerate(samp_neighs):
        cols = [unique_nodes[n] for n in samp]
        nb_np[i, : len(cols)] = cols

    # features(unique_nodes, rel[-1]) -> table gather (glue)
    feats_np = np.asarray(feature_table)[np.array(unique_nodes_list)]
    w_np = np.asarray(pool_matrix)

    feats_p = np.zeros((u_pad, d_pad), dtype=np.float32)
    feats_p[:n_unique, :feat_dim] = feats_np
    w_p = np.zeros((d_pad, d_pad), dtype=np.float32)
    w_p[:feat_dim, :feat_dim] = w_np

    feats_j = jnp.asarray(feats_p, dtype=jnp.bfloat16)   # mask-free: only feats/W cast
    w_j = jnp.asarray(w_p, dtype=jnp.bfloat16)
    nb_j = jnp.asarray(nb_np)

    # --- run kernels ----------------------------------------------------------
    embed = compute_embed(feats_j, w_j)                    # f32[u_pad, d_pad]
    out_pad = pool_aggregate(nb_j, embed, tile_n=tile_n)   # bf16[n_pad, d_pad]
    out = out_pad[:n_nodes, :feat_dim]
    jax.block_until_ready(out)

    # --- reference (plain f32 JAX); tolerance loosened for bf16 ops/output ---
    mask_np = np.zeros((n_nodes, n_unique), dtype=np.float32)
    for i, samp in enumerate(samp_neighs):
        for n in samp:
            mask_np[i, unique_nodes[n]] = 1.0
    ref = jnp.maximum(
        jnp.asarray(mask_np) @ (jnp.asarray(feats_np) @ jnp.asarray(w_np)), 0.0
    )
    assert out.shape == (n_nodes, feat_dim)
    np.testing.assert_allclose(
        np.asarray(out.astype(jnp.float32)), np.asarray(ref), rtol=2e-2, atol=2e-2
    )

    print("KERNEL_OK")
</pallas_src>

<mosaic_0001>
module attributes {stable_mosaic.version = 11 : i64} {
  func.func @embed_kernel(%arg0: i32, %arg1: memref<128x128xbf16, #tpu.memory_space<vmem>>, %arg2: memref<128x128xbf16, #tpu.memory_space<vmem>>, %arg3: memref<128x128xf32, #tpu.memory_space<vmem>>) attributes {dimension_semantics = [#tpu.dimension_semantics<parallel>], iteration_bounds = array<i64: 1>, scalar_prefetch = 0 : i64, scratch_operands = 0 : i64, tpu.core_type = #tpu.core_type<tc>, window_params = [{transform_indices = @transform_0, window_bounds = array<i64: 128, 128>}, {pipeline_mode = #tpu.pipeline_mode<synchronous>, transform_indices = @transform_1, window_bounds = array<i64: 128, 128>}, {transform_indices = @transform_2, window_bounds = array<i64: 128, 128>}]} {
    %c0 = arith.constant 0 : index
    %c0_0 = arith.constant 0 : index
    %0 = vector.load %arg1[%c0, %c0_0] : memref<128x128xbf16, #tpu.memory_space<vmem>>, vector<128x128xbf16>
    %c0_1 = arith.constant 0 : index
    %c0_2 = arith.constant 0 : index
    %1 = vector.load %arg2[%c0_1, %c0_2] : memref<128x128xbf16, #tpu.memory_space<vmem>>, vector<128x128xbf16>
    %cst = arith.constant dense<0.000000e+00> : vector<128x128xf32>
    %2 = tpu.matmul %0, %1, %cst {dimension_numbers = #tpu.dot_dimension_numbers<[1], [0], [0], [1], [0, 0, 1, 1], [], []>} : vector<128x128xbf16>, vector<128x128xbf16>, vector<128x128xf32> -> vector<128x128xf32>
    %c0_3 = arith.constant 0 : index
    %c0_4 = arith.constant 0 : index
    %3 = vector.load %arg3[%c0_3, %c0_4] : memref<128x128xf32, #tpu.memory_space<vmem>>, vector<128x128xf32>
    tpu.vector_store %arg3[%c0_3, %c0_4], %2 {strides = array<i32>} : memref<128x128xf32, #tpu.memory_space<vmem>>, vector<128x128xf32>,
    return
  }
  func.func @transform_0(%arg0: i32) -> (i32, i32) {
    %c0_i32 = arith.constant 0 : i32
    %c0_i32_0 = arith.constant 0 : i32
    return %arg0, %c0_i32 : i32, i32
  }
  func.func @transform_1(%arg0: i32) -> (i32, i32) {
    %c0_i32 = arith.constant 0 : i32
    %c0_i32_0 = arith.constant 0 : i32
    %c0_i32_1 = arith.constant 0 : i32
    return %c0_i32, %c0_i32_0 : i32, i32
  }
  func.func @transform_2(%arg0: i32) -> (i32, i32) {
    %c0_i32 = arith.constant 0 : i32
    %c0_i32_0 = arith.constant 0 : i32
    return %arg0, %c0_i32 : i32, i32
  }
}

</mosaic_0001>

<bundles_post_ra>
// kernel: tpu_custom_call.1
= control target key start
LH: loop header
LB: loop body
LE: loop exit
PB: predicated region body
PF: predicated region fallthrough
CT: control target
= control target key end

     0   :  { %7 = vsyncpa [#allocation3], 0  ;;  %s477_s0 = inlined_call_operand.hbm [shape: bf16[128,128], index: 0, kind: input, shape index: {}]   ;;  %s478_s1 = inlined_call_operand.hbm [shape: bf16[128,128], index: 1, kind: input, shape index: {}]   ;;  %s479_s2 = inlined_call_operand.hbm [shape: f32[128,128], index: 2, kind: output, shape index: {}]  }
   0x1   :  { %8 = vsyncpa [#allocation6], 0 }
   0x2   :  { %9 = vsyncpa [#allocation4], 0  ;;  %s14_s11 = sshll.u32 %s477_s0, 4  ;;  %s446_s12 = smov [#allocation2]   ;;  %s15_s11 = int_to_ptr.hbm [resolvable:$true] %s14_s11 }
   0x3   :  { %s16_s13 = sshll.u32 %s446_s12, 4  ;;  %s27_s16 = sshll.u32 %s478_s1, 4  ;;  %s17_s13 = int_to_ptr.vmem [resolvable:$true] %s16_s13  ;;  %s28_s16 = int_to_ptr.hbm [resolvable:$true] %s27_s16 }
   0x4   :  { %s447_s17 = smov 64   ;;  %s448_s18 = smov 4  }
   0x5   :  { %22 = dma.hbm_to_vmem [thread:$0]  %s15_s11, 1024, %s17_s13, [#allocation3], %s447_s17, %s447_s17, %s448_s18  }
   0x6   :  { %s449_s19 = smov [#allocation5]  }
   0x7   :  { %s29_s20 = sshll.u32 %s449_s19, 4  ;;  %s30_s20 = int_to_ptr.vmem [resolvable:$true] %s29_s20 }
   0x8   :  { %35 = dma.hbm_to_vmem [thread:$0]  %s28_s16, 1024, %s30_s20, [#allocation6], %s447_s17, %s447_s17, %s448_s18  }
   0x9   :  { %440 = dma.done.wait [#allocation3], 1024  }
   0xa   :  { %441 = vsyncadd [#allocation3], 4294966272 }
   0xb   :  { %442 = dma.done.wait [#allocation6], 1024  }
   0xc   :  { %443 = vsyncadd [#allocation6], 4294966272  ;;  %v336_v0 = vld [vmem:[#allocation5 + $0x38] sm:$0xff]  ;;  %v335_v1 = vld [vmem:[#allocation5 + $0x30] sm:$0xff]  ;;  %s450_s0 = smov [#allocation7]   ;;  %s243_s23 = sshll.u32 %s479_s2, 4  ;;  %s244_s23 = int_to_ptr.hbm [resolvable:$true] %s243_s23 }
   0xd   :  { %172 = vmatpush.bf16.msra.mxu0 %v336_v0  ;;  %337 = vmatpush.bf16.msra.mxu1 %v336_v0  ;;  %v334_v2 = vld [vmem:[#allocation5 + $0x28] sm:$0xff]  ;;  %v333_v3 = vld [vmem:[#allocation5 + $0x20] sm:$0xff]  ;;  %v332_v4 = vld [vmem:[#allocation5 + $0x18] sm:$0xff]  ;;  %s241_s1 = sshll.u32 %s450_s0, 4  ;;  %s451_s24 = smov 128   ;;  %s242_s1 = int_to_ptr.vmem [resolvable:$true] %s241_s1 }
   0xe   :  { %338 = vmatpush.bf16.msra.mxu2 %v336_v0  ;;  %339 = vmatpush.bf16.msra.mxu3 %v336_v0  ;;  %v331_v5 = vld [vmem:[#allocation5 + $0x10] sm:$0xff]  ;;  %v330_v6 = vld [vmem:[#allocation5 + $0x8] sm:$0xff]  ;;  %v329_v7 = vld [vmem:[#allocation5] sm:$0xff]  ;;  %s452_s25 = smov 8  }
   0xf   :  { %v321_v8 = vld [vmem:[#allocation2] sm:$0xff]  ;;  %v323_v9 = vld [vmem:[#allocation2 + $0x10] sm:$0xff]  ;;  %v322_v12 = vld [vmem:[#allocation2 + $0x8] sm:$0xff] }
  0x10   :  { %v325_v10 = vld [vmem:[#allocation2 + $0x20] sm:$0xff]  ;;  %v327_v11 = vld [vmem:[#allocation2 + $0x30] sm:$0xff]  ;;  %v324_v13 = vld [vmem:[#allocation2 + $0x18] sm:$0xff] }
  0x11   :  { %173 = vmatpush.bf16.msra.mxu0 %v335_v1  ;;  %340 = vmatpush.bf16.msra.mxu1 %v335_v1  ;;  %v326_v14 = vld [vmem:[#allocation2 + $0x28] sm:$0xff]  ;;  %v328_v15 = vld [vmem:[#allocation2 + $0x38] sm:$0xff] }
  0x12   :  { %341 = vmatpush.bf16.msra.mxu2 %v335_v1  ;;  %342 = vmatpush.bf16.msra.mxu3 %v335_v1 }
  0x15   :  { %174 = vmatpush.bf16.msra.mxu0 %v334_v2  ;;  %343 = vmatpush.bf16.msra.mxu1 %v334_v2 }
  0x16   :  { %344 = vmatpush.bf16.msra.mxu2 %v334_v2  ;;  %345 = vmatpush.bf16.msra.mxu3 %v334_v2 }
  0x19   :  { %175 = vmatpush.bf16.msra.mxu0 %v333_v3  ;;  %346 = vmatpush.bf16.msra.mxu1 %v333_v3 }
  0x1a   :  { %347 = vmatpush.bf16.msra.mxu2 %v333_v3  ;;  %348 = vmatpush.bf16.msra.mxu3 %v333_v3 }
  0x1d   :  { %176 = vmatpush.bf16.msra.mxu0 %v332_v4  ;;  %349 = vmatpush.bf16.msra.mxu1 %v332_v4 }
  0x1e   :  { %350 = vmatpush.bf16.msra.mxu2 %v332_v4  ;;  %351 = vmatpush.bf16.msra.mxu3 %v332_v4 }
  0x21   :  { %177 = vmatpush.bf16.msra.mxu0 %v331_v5  ;;  %352 = vmatpush.bf16.msra.mxu1 %v331_v5 }
  0x22   :  { %353 = vmatpush.bf16.msra.mxu2 %v331_v5  ;;  %354 = vmatpush.bf16.msra.mxu3 %v331_v5 }
  0x25   :  { %178 = vmatpush.bf16.msra.mxu0 %v330_v6  ;;  %355 = vmatpush.bf16.msra.mxu1 %v330_v6 }
  0x26   :  { %356 = vmatpush.bf16.msra.mxu2 %v330_v6  ;;  %357 = vmatpush.bf16.msra.mxu3 %v330_v6 }
  0x29   :  { %179 = vmatpush.bf16.msra.mxu0 %v329_v7  ;;  %358 = vmatpush.bf16.msra.mxu1 %v329_v7 }
  0x2a   :  { %359 = vmatpush.bf16.msra.mxu2 %v329_v7  ;;  %360 = vmatpush.bf16.msra.mxu3 %v329_v7 }
  0x2c   :  { %180 = vmatmul.bf16.vlgmr.msra.gmra.mxu0 %v321_v8  ;;  %190 = vmatmul.bf16.vlgmr.msra.gmra.mxu1 %v323_v9 }
  0x2d   :  { %200 = vmatmul.bf16.vlgmr.msra.gmra.mxu2 %v325_v10  ;;  %210 = vmatmul.bf16.vlgmr.msra.gmra.mxu3 %v327_v11 }
  0x3c   :  { %185 = vmatmul.bf16.gmra.mxu0 %v322_v12  ;;  %195 = vmatmul.bf16.gmra.mxu1 %v324_v13 }
  0x3d   :  { %205 = vmatmul.bf16.gmra.mxu2 %v326_v14  ;;  %215 = vmatmul.bf16.gmra.mxu3 %v328_v15 }
  0xa9   :  { %v181_v16 = vpop.f32.mrf.mxu0  ;;  %v191_v17 = vpop.f32.mrf.mxu1 }
  0xaa   :  { %221 = vst [vmem:[#allocation7] sm:$0xff] %v181_v16 }
  0xab   :  { %225 = vst [vmem:[#allocation7 + $0x20] sm:$0xff] %v191_v17 }
  0xb0   :  { %v201_v18 = vpop.f32.mrf.mxu2  ;;  %v211_v19 = vpop.f32.mrf.mxu3 }
  0xb1   :  { %229 = vst [vmem:[#allocation7 + $0x40] sm:$0xff] %v201_v18  ;;  %v183_v20 = vpop.f32.mrf.mxu0  ;;  %v193_v21 = vpop.f32.mrf.mxu1 }
  0xb2   :  { %233 = vst [vmem:[#allocation7 + $0x60] sm:$0xff] %v211_v19 }
  0xb3   :  { %222 = vst [vmem:[#allocation7 + $0x8] sm:$0xff] %v183_v20 }
  0xb4   :  { %226 = vst [vmem:[#allocation7 + $0x28] sm:$0xff] %v193_v21 }
  0xb8   :  { %v203_v22 = vpop.f32.mrf.mxu2  ;;  %v213_v23 = vpop.f32.mrf.mxu3 }
  0xb9   :  { %230 = vst [vmem:[#allocation7 + $0x48] sm:$0xff] %v203_v22  ;;  %v186_v24 = vpop.f32.mrf.mxu0  ;;  %v196_v25 = vpop.f32.mrf.mxu1 }
  0xba   :  { %234 = vst [vmem:[#allocation7 + $0x68] sm:$0xff] %v213_v23 }
  0xbb   :  { %223 = vst [vmem:[#allocation7 + $0x10] sm:$0xff] %v186_v24 }
  0xbc   :  { %227 = vst [vmem:[#allocation7 + $0x30] sm:$0xff] %v196_v25 }
  0xc0   :  { %v206_v26 = vpop.f32.mrf.mxu2  ;;  %v216_v27 = vpop.f32.mrf.mxu3 }
  0xc1   :  { %231 = vst [vmem:[#allocation7 + $0x50] sm:$0xff] %v206_v26  ;;  %v188_v28 = vpop.f32.mrf.mxu0  ;;  %v198_v29 = vpop.f32.mrf.mxu1 }
  0xc2   :  { %235 = vst [vmem:[#allocation7 + $0x70] sm:$0xff] %v216_v27 }
  0xc3   :  { %224 = vst [vmem:[#allocation7 + $0x18] sm:$0xff] %v188_v28 }
  0xc4   :  { %228 = vst [vmem:[#allocation7 + $0x38] sm:$0xff] %v198_v29 }
  0xc8   :  { %v208_v30 = vpop.f32.mrf.mxu2  ;;  %v218_v31 = vpop.f32.mrf.mxu3 }
  0xc9   :  { %232 = vst [vmem:[#allocation7 + $0x58] sm:$0xff] %v208_v30 }
  0xca   :  { %236 = vst [vmem:[#allocation7 + $0x78] sm:$0xff] %v218_v31 }
  0xcb   :  { %249 = dma.vmem_to_hbm [thread:$0]  %s242_s1, 2048, %s244_s23, [#allocation4], %s451_s24, %s451_s24, %s452_s25  }
  0xcc   :  { %444 = dma.done.wait [#allocation4], 2048  }
  0xcd   :  { %445 = vsyncadd [#allocation4], 4294965248 }
  0xce   :  { %254 = vsyncpa [#allocation3], 1 }
  0xcf   :  { %255 = vsyncpa [#allocation6], 1 }
  0xd0   :  { %256 = vsyncpa [#allocation4], 1 }

</bundles_post_ra>
